<compile_context>
chip_gen: v7x
topology: tpu7x:2x2x1
jax: 0.10.0
libtpu: 0.0.40
codegen_flags: <defaults>
</compile_context>

<pallas_src>
import functools

import jax
import jax.numpy as jnp
from jax.experimental import pallas as pl
from jax.experimental.pallas import tpu as pltpu

LANE = 128
DEFAULT_BLOCK_ROWS = 4096  # (4096, 128) f32 = 2 MiB per input per buffer (sweep 4096-8192)


def _huber_kernel(pred_ref, target_ref, out_ref, *, delta, total_rows, needs_row_mask):
    """Per-block partial reduction.

    out_ref block is (1, 2, LANE):
      row 0: per-lane partial sum of Huber losses over valid (target > 0) elements
      row 1: per-lane partial count of valid elements
    """
    i = pl.program_id(0)
    blk = pred_ref.shape[0]  # static

    # Upcast in-kernel (VPU work hidden under DMA; feeding bf16 halves HBM bytes).
    t = target_ref[...].astype(jnp.float32)
    p = pred_ref[...].astype(jnp.float32)

    def emit(valid):
        err = t - p
        abs_e = jnp.abs(err)
        c = jnp.minimum(abs_e, delta)
        # Algebraic Huber: c*(|e| - 0.5c) == 0.5|e|^2 when |e|<=delta, delta*(|e|-0.5*delta) else.
        loss = jnp.where(valid, c * (abs_e - 0.5 * c), 0.0)
        s = jnp.sum(loss, axis=0, keepdims=True)                       # (1, LANE)
        k = jnp.sum(valid.astype(jnp.float32), axis=0, keepdims=True)  # (1, LANE)
        out_ref[0] = jnp.concatenate([s, k], axis=0)                   # (2, LANE)

    base_valid = t > 0.0  # valid_mask = (target > 0); zero-padded ragged tail is excluded here

    if needs_row_mask:
        # Only the (partial) last grid block can see rows past the real array; gate the
        # iota/compare/and there so every full block pays zero extra VALU work.
        last = pl.num_programs(0) - 1

        @pl.when(i != last)
        def _():
            emit(base_valid)

        @pl.when(i == last)
        def _():
            row_ids = i * blk + jax.lax.broadcasted_iota(jnp.int32, (blk, LANE), 0)
            emit(base_valid & (row_ids < total_rows))
    else:
        emit(base_valid)


def huber_loss(pred, target, delta=19.0, block_rows=DEFAULT_BLOCK_ROWS):
    """Mean Huber loss over elements where target > 0 (matches the PyTorch module)."""
    assert pred.ndim == target.ndim, "inconsistent dimensions"
    delta = float(delta)

    p = pred.reshape(-1)
    t = target.reshape(-1)
    n = p.shape[0]

    # Sublane packing of the narrower input dtype (8 for f32, 16 for bf16, 32 for int8/fp8):
    # keeps packed vregs unmasked on the sub-32-bit fast path.
    min_itemsize = min(p.dtype.itemsize, t.dtype.itemsize)
    pack = max(8, 32 // int(min_itemsize))
    block_rows = max(pack, (int(block_rows) // pack) * pack)

    rows = pl.cdiv(n, LANE)
    if n % LANE != 0:
        # Only the ragged tail (< 128 elements) needs zero-padding so the flat array can be
        # viewed lane-dense as (rows, 128); padded target == 0 -> excluded by the mask.
        # TODO(synk): this still materializes one padded copy per input for ragged n; a truly
        # copy-free path would need a dense 2-D view of a non-multiple-of-128 buffer, which
        # Mosaic's (8,128) lane layout does not provide.
        pad = rows * LANE - n
        p = jnp.pad(p, (0, pad))
        t = jnp.pad(t, (0, pad))

    p2 = p.reshape(rows, LANE)
    t2 = t.reshape(rows, LANE)

    # Tile choice: big blocks amortize per-step overhead; if the whole array fits in one
    # block, still split into two so both TensorCores (v7x) get work.
    if rows > block_rows:
        blk = block_rows
    else:
        blk = pl.cdiv(pl.cdiv(rows, 2), pack) * pack
        if blk >= rows:
            blk = rows  # tiny input: single full-extent block (always a legal block shape)
    grid_n = pl.cdiv(rows, blk)
    needs_row_mask = (rows % blk) != 0

    kernel = functools.partial(
        _huber_kernel, delta=delta, total_rows=rows, needs_row_mask=needs_row_mask
    )

    in_bytes = rows * LANE * (p2.dtype.itemsize + t2.dtype.itemsize)
    out_bytes = grid_n * 2 * LANE * 4
    # Double-buffered input blocks + headroom; needed on v5e (16 MiB default scoped VMEM)
    # when block_rows is raised to 8192.
    vmem_limit = max(
        16 << 20, 2 * blk * LANE * (p2.dtype.itemsize + t2.dtype.itemsize) + (8 << 20)
    )

    partials = pl.pallas_call(
        kernel,
        out_shape=jax.ShapeDtypeStruct((grid_n, 2, LANE), jnp.float32),
        grid_spec=pltpu.PrefetchScalarGridSpec(
            num_scalar_prefetch=0,
            grid=(grid_n,),
            in_specs=[
                pl.BlockSpec((blk, LANE), lambda i: (i, 0)),
                pl.BlockSpec((blk, LANE), lambda i: (i, 0)),
            ],
            out_specs=pl.BlockSpec((1, 2, LANE), lambda i: (i, 0, 0)),
        ),
        compiler_params=pltpu.CompilerParams(
            # Each step writes its own partial block -> no carried state, so the grid axis
            # can be sharded across TensorCores (matters on v7x megacore).
            dimension_semantics=("parallel",),
            vmem_limit_bytes=int(min(vmem_limit, 48 << 20)),
        ),
        cost_estimate=pl.CostEstimate(
            flops=9 * rows * LANE,
            transcendentals=0,
            bytes_accessed=int(in_bytes + out_bytes),
        ),
    )(p2, t2)

    total = jnp.sum(partials[:, 0, :])
    # Per-block/lane counts are exact integers (<= blk), so summing them as int32 keeps the
    # final count exact even when the number of valid elements exceeds 2^24.
    count = jnp.sum(partials[:, 1, :].astype(jnp.int32))
    # NaN if no element has target > 0, matching torch .mean() over an empty selection.
    return total / count


def _huber_loss_ref(pred, target, delta=19.0):
    pred = pred.astype(jnp.float32)
    target = target.astype(jnp.float32)
    err = target - pred
    valid = target > 0
    abs_e = jnp.abs(err)
    loss = jnp.where(abs_e <= delta, 0.5 * abs_e**2, delta * (abs_e - 0.5 * delta))
    loss = jnp.where(valid, loss, 0.0)
    return jnp.sum(loss) / jnp.sum(valid)


if __name__ == "__main__":
    key = jax.random.PRNGKey(0)
    k1, k2, k3, k4, k5, k6 = jax.random.split(key, 6)

    # NCHW, as the PyTorch module would receive.
    B, C, H, W = 2, 4, 16, 16
    pred = jax.random.normal(k1, (B, C, H, W), dtype=jnp.float32) * 10.0
    target = jax.random.normal(k2, (B, C, H, W), dtype=jnp.float32) * 30.0

    out = jax.block_until_ready(huber_loss(pred, target, delta=19.0))
    ref = _huber_loss_ref(pred, target, delta=19.0)
    assert jnp.allclose(out, ref, rtol=1e-5, atol=1e-5), (out, ref)

    # Multi-block path with a partial (row-masked) last grid block: rows=20, blk=8.
    pred2 = jax.random.normal(k3, (2, 4, 16, 20), dtype=jnp.float32) * 10.0
    target2 = jax.random.normal(k4, (2, 4, 16, 20), dtype=jnp.float32) * 30.0
    out2 = jax.block_until_ready(huber_loss(pred2, target2, delta=19.0, block_rows=8))
    ref2 = _huber_loss_ref(pred2, target2, delta=19.0)
    assert jnp.allclose(out2, ref2, rtol=1e-5, atol=1e-5), (out2, ref2)

    # Ragged shape (not a multiple of 128): zero-padded tail + masked partial last block.
    pred3 = jax.random.normal(k5, (1, 3, 17, 23), dtype=jnp.float32) * 10.0
    target3 = jax.random.normal(k6, (1, 3, 17, 23), dtype=jnp.float32) * 30.0
    out3 = jax.block_until_ready(huber_loss(pred3, target3, delta=19.0, block_rows=8))
    ref3 = _huber_loss_ref(pred3, target3, delta=19.0)
    assert jnp.allclose(out3, ref3, rtol=1e-5, atol=1e-5), (out3, ref3)

    # bf16 inputs: exercises the in-kernel upcast and the 16-row sublane packing path.
    out4 = jax.block_until_ready(
        huber_loss(pred.astype(jnp.bfloat16), target.astype(jnp.bfloat16), delta=19.0)
    )
    ref4 = _huber_loss_ref(pred.astype(jnp.bfloat16), target.astype(jnp.bfloat16), delta=19.0)
    assert jnp.allclose(out4, ref4, rtol=1e-4, atol=1e-4), (out4, ref4)

    print("KERNEL_OK")
</pallas_src>

<mosaic_0001>
module attributes {stable_mosaic.version = 11 : i64} {
  func.func @_huber_kernel(%arg0: i32, %arg1: memref<8x128xf32, #tpu.memory_space<vmem>>, %arg2: memref<8x128xf32, #tpu.memory_space<vmem>>, %arg3: memref<1x2x128xf32, #tpu.memory_space<vmem>>) attributes {dimension_semantics = [#tpu.dimension_semantics<parallel>], iteration_bounds = array<i64: 2>, scalar_prefetch = 0 : i64, scratch_operands = 0 : i64, tpu.core_type = #tpu.core_type<tc>, window_params = [{transform_indices = @transform_0, window_bounds = array<i64: 8, 128>}, {transform_indices = @transform_1, window_bounds = array<i64: 8, 128>}, {transform_indices = @transform_2, window_bounds = array<i64: 1, 2, 128>}]} {
    %c0 = arith.constant 0 : index
    %c0_0 = arith.constant 0 : index
    %0 = vector.load %arg2[%c0, %c0_0] : memref<8x128xf32, #tpu.memory_space<vmem>>, vector<8x128xf32>
    %c0_1 = arith.constant 0 : index
    %c0_2 = arith.constant 0 : index
    %1 = vector.load %arg1[%c0_1, %c0_2] : memref<8x128xf32, #tpu.memory_space<vmem>>, vector<8x128xf32>
    %cst = arith.constant 0.000000e+00 : f32
    %2 = vector.broadcast %cst : f32 to vector<8x128xf32>
    %3 = arith.cmpf ogt, %0, %2 : vector<8x128xf32>
    %4 = arith.subf %0, %1 : vector<8x128xf32>
    %5 = math.absf %4 : vector<8x128xf32>
    %cst_3 = arith.constant 1.900000e+01 : f32
    %6 = vector.broadcast %cst_3 : f32 to vector<8x128xf32>
    %7 = arith.minimumf %5, %6 : vector<8x128xf32>
    %cst_4 = arith.constant 5.000000e-01 : f32
    %8 = vector.broadcast %cst_4 : f32 to vector<8x128xf32>
    %9 = arith.mulf %8, %7 : vector<8x128xf32>
    %10 = arith.subf %5, %9 : vector<8x128xf32>
    %11 = arith.mulf %7, %10 : vector<8x128xf32>
    %cst_5 = arith.constant 0.000000e+00 : f32
    %12 = vector.broadcast %cst_5 : f32 to vector<8x128xf32>
    %13 = arith.select %3, %11, %12 : vector<8x128xi1>, vector<8x128xf32>
    %cst_6 = arith.constant dense<0.000000e+00> : vector<128xf32>
    %14 = vector.multi_reduction <add>, %13, %cst_6 [0] : vector<8x128xf32> to vector<128xf32>
    %15 = vector.shape_cast %14 : vector<128xf32> to vector<1x128xf32>
    %16 = arith.extui %3 : vector<8x128xi1> to vector<8x128xi32>
    %17 = arith.sitofp %16 : vector<8x128xi32> to vector<8x128xf32>
    %cst_7 = arith.constant dense<0.000000e+00> : vector<128xf32>
    %18 = vector.multi_reduction <add>, %17, %cst_7 [0] : vector<8x128xf32> to vector<128xf32>
    %19 = vector.shape_cast %18 : vector<128xf32> to vector<1x128xf32>
    %20 = tpu.concatenate %15, %19 in 0 : vector<1x128xf32>, vector<1x128xf32> -> vector<2x128xf32>
    %c0_8 = arith.constant 0 : index
    %c0_9 = arith.constant 0 : index
    %c0_10 = arith.constant 0 : index
    %21 = vector.load %arg3[%c0_8, %c0_9, %c0_10] : memref<1x2x128xf32, #tpu.memory_space<vmem>>, vector<1x2x128xf32>
    %22 = vector.shape_cast %21 : vector<1x2x128xf32> to vector<2x128xf32>
    %23 = vector.shape_cast %20 : vector<2x128xf32> to vector<1x2x128xf32>
    tpu.vector_store %arg3[%c0_8, %c0_9, %c0_10], %23 {strides = array<i32>} : memref<1x2x128xf32, #tpu.memory_space<vmem>>, vector<1x2x128xf32>,
    return
  }
  func.func @transform_0(%arg0: i32) -> (i32, i32) {
    %c0_i32 = arith.constant 0 : i32
    %c0_i32_0 = arith.constant 0 : i32
    return %arg0, %c0_i32 : i32, i32
  }
  func.func @transform_1(%arg0: i32) -> (i32, i32) {
    %c0_i32 = arith.constant 0 : i32
    %c0_i32_0 = arith.constant 0 : i32
    return %arg0, %c0_i32 : i32, i32
  }
  func.func @transform_2(%arg0: i32) -> (i32, i32, i32) {
    %c0_i32 = arith.constant 0 : i32
    %c0_i32_0 = arith.constant 0 : i32
    %c0_i32_1 = arith.constant 0 : i32
    return %arg0, %c0_i32, %c0_i32_0 : i32, i32, i32
  }
}

</mosaic_0001>

<bundles_post_ra>
// kernel: tpu_custom_call.1
= control target key start
LH: loop header
LB: loop body
LE: loop exit
PB: predicated region body
PF: predicated region fallthrough
CT: control target
= control target key end

     0   :  { %7 = vsyncpa [#allocation3], 0  ;;  %s759_s0 = inlined_call_operand.hbm [shape: f32[16,128], index: 0, kind: input, shape index: {}]   ;;  %s760_s1 = inlined_call_operand.hbm [shape: f32[16,128], index: 1, kind: input, shape index: {}]   ;;  %s761_s2 = inlined_call_operand.hbm [shape: f32[2,2,128], index: 2, kind: output, shape index: {}]  }
   0x1   :  { %9 = vsyncpa [#allocation3 + $0x1], 0 }
   0x2   :  { %10 = vsyncpa [#allocation6], 0 }
   0x3   :  { %12 = vsyncpa [#allocation6 + $0x1], 0 }
   0x4   :  { %13 = vsyncpa [#allocation4], 0 }
   0x5   :  { %15 = vsyncpa [#allocation4 + $0x1], 0  ;;  %s549_s9 = smov 0   ;;  %s551_s10 = smov 0  }
   0x6   :  { %s553_s11 = smov 0   ;;  %s555_s12 = smov 0  }
   0x7 LB: > { %s570_s13 = sadd.s32 4294967295, %s528_s12   ;;  %s330_s14 = sadd.s32 4294967294, %s528_s12   ;;  %s528_s12 = sphi %s555_s12, %s780_s12   ;;  %s524_s11 = sphi %s553_s11, %s779_s11   ;;  %s520_s10 = sphi %s551_s10, %s778_s10   ;;  %s516_s9 = sphi %s549_s9, %s777_s9  }
   0x8   : > { %s574_s15 = sadd.s32 1, %s528_s12   ;;  %s28_s16 = sadd.s32 1, %s524_s11 }
   0x9   : > { %s25_s17 = ssub.s32 %s528_s12, %s574_s15  ;;  %p35_p0 = scmp.ne.s32.totalorder %s524_s11, %s520_s10 }
   0xa   : > { %p26_p1 = scmp.eq.s32.totalorder %s25_s17, 0  ;;  %p36_p2 = scmp.eq.s32.totalorder %s528_s12, 0 }
   0xb   : > { %p41_p3 = scmp.ne.s32.totalorder %s520_s10, %s516_s9  ;;  %p42_p4 = scmp.eq.s32.totalorder %s570_s13, 0 }
   0xc   : > { %s586_s18 = scalar_select %p26_p1, %s524_s11, %s28_s16  }
   0xd   : > { %p588_p5 = por %p36_p2, %p35_p0  ;;  %p592_p6 = por %p42_p4, %p41_p3 }
   0xe   : > { %p91_p7 = scmp.eq.s32.totalorder %s570_s13, 1  ;;  %p97_p8 = scmp.eq.s32.totalorder %s330_s14, 1 }
   0xf   : > { %s765_s20 = scalar_select %p592_p6, 1, 0 }
  0x10   : > { %p363_p10 = scmp.lt.s32.totalorder %s528_s12, 2  ;;  %p599_p11 = por %p91_p7, %p35_p0 }
  0x11   : > { %p603_p12 = por %p97_p8, %p41_p3  ;;  %s608_s23 = sand.u32 1, %s524_s11  }
  0x12   : > { %s766_s21 = scalar_select %p599_p11, 1, 0 }
  0x13   : > { %s767_s22 = scalar_select %p603_p12, 1, 0 }
  0x14   : > { %s334_s24 = sshll.u32 %s528_s12, 7  ;;  %s333_s25 = sshll.u32 %s608_s23, 3 }
  0x15   : > { %s617_s28 = scalar_lea.hbm %s759_s0, %s334_s24  ;;  %s121_s29 = scalar_lea.vmem [#allocation2], %s333_s25 }
  0x16   : > { %s128_s30 = sshll.u32 %s121_s29, 4  ;;  %p623_p13 = pnand %p363_p10, %p588_p5  ;;  %s627_s30 = int_to_ptr.vmem [resolvable:$true] %s128_s30 }
  0x17   : > { %s118_s4 = scalar_lea.sflag [#allocation3], %s608_s23  ;;  %s398_s5 = scalar_lea.hbm %s617_s28, 128 }
  0x18   : > { %p399_p2 = scmp.ne.s32.totalorder %s617_s28, %s398_s5  ;;  %p400_p3 = pneg %p623_p13 }
  0x19   : > { %s403_s8 = scalar_lea.hbm %s759_s0, 256  ;;  %p404_p5 = scmp.lt.u32.totalorder %s617_s28, %s759_s0 }
  0x1a   : > { %p401_p4 = pnand %p400_p3, %p399_p2  ;;  %p405_p8 = scmp.lt.u32.totalorder %s403_s8, %s398_s5 }
  0x1b   : > { %p407_p9 = scmp.lt.u32.totalorder %s398_s5, %s617_s28 }
  0x1c   : > { %p402_p7 = pneg %p401_p4  ;;  %p406_p10 = por %p405_p8, %p404_p5 }
  0x1e   : > { %p408_p0 = por %p407_p9, %p406_p10 }
  0x20   : > { %p409_p1 = pnand %p408_p0, %p402_p7 }
  0x22   : > { %412 = shalt.err (!%p409_p1)
}
  0x23   : > { %s413_s17 = scalar_lea.vmem %s627_s30, 128  ;;  %s530_s19 = smov [#allocation2]  }
  0x24   : > { %p414_p2 = scmp.ne.s32.totalorder %s627_s30, %s413_s17  ;;  %s418_s26 = sshll.u32 %s530_s19, 4  ;;  %s419_s26 = int_to_ptr.vmem [resolvable:$false] %s418_s26 }
  0x25   : > { %s420_s27 = scalar_lea.vmem %s419_s26, 256  ;;  %p421_p11 = scmp.lt.s32.totalorder %s627_s30, %s419_s26 }
  0x26   : > { %p416_p4 = pnand %p414_p2, %p400_p3  ;;  %p422_p5 = scmp.lt.s32.totalorder %s420_s27, %s413_s17 }
  0x28   : > { %p417_p12 = pneg %p416_p4  ;;  %p423_p8 = por %p422_p5, %p421_p11 }
  0x2a   : > { %p424_p9 = pnand %p423_p8, %p417_p12 }
  0x2c   : > { %427 = shalt.err (!%p424_p9)
}
  0x2d   : > { %355 = dma.hbm_to_vmem [thread:$0]  (!%p623_p13), %s617_s28, 128, %s627_s30, %s118_s4  }
  0x2e   : > { %p769_p0 = scmp.lt.s32.totalorder %s528_s12, 3  ;;  %p770_p1 = scmp.ge.s32.totalorder %s528_s12, 1 }
  0x2f   : > { %s670_s7 = scalar_lea.hbm %s760_s1, %s334_s24  ;;  %s139_s8 = scalar_lea.vmem [#allocation5], %s333_s25 }
  0x30   : > { %p661_p7 = pnand %p770_p1, %p769_p0  ;;  %s146_s14 = sshll.u32 %s139_s8, 4  ;;  %s147_s14 = int_to_ptr.vmem [resolvable:$true] %s146_s14 }
  0x31   : > { %s136_s28 = scalar_lea.sflag [#allocation6], %s608_s23  ;;  %s428_s30 = scalar_lea.hbm %s670_s7, 128 }
  0x32   : > { %s771_s29 = scalar_select %p661_p7, 1, 0 }
  0x33   : > { %p429_p11 = scmp.ne.s32.totalorder %s670_s7, %s428_s30  ;;  %s433_s24 = scalar_lea.hbm %s760_s1, 256 }
  0x34   : > { %p434_p2 = scmp.lt.u32.totalorder %s670_s7, %s760_s1  ;;  %p435_p4 = scmp.lt.u32.totalorder %s433_s24, %s428_s30 }
  0x35   : > { %p431_p12 = pnand %p429_p11, %p400_p3  ;;  %p437_p8 = scmp.lt.u32.totalorder %s428_s30, %s670_s7 }
  0x36   : > { %p436_p5 = por %p435_p4, %p434_p2 }
  0x37   : > { %p432_p10 = pneg %p431_p12 }
  0x38   : > { %p438_p9 = por %p437_p8, %p436_p5 }
  0x3a   : > { %p439_p0 = pnand %p438_p9, %p432_p10 }
  0x3c   : > { %442 = shalt.err (!%p439_p0)
}
  0x3d   : > { %s443_s23 = scalar_lea.vmem %s147_s14, 128  ;;  %s531_s25 = smov [#allocation5]  }
  0x3e   : > { %p444_p1 = scmp.ne.s32.totalorder %s147_s14, %s443_s23  ;;  %s448_s26 = sshll.u32 %s531_s25, 4  ;;  %s449_s26 = int_to_ptr.vmem [resolvable:$false] %s448_s26 }
  0x3f   : > { %s450_s27 = scalar_lea.vmem %s449_s26, 256  ;;  %p451_p6 = scmp.lt.s32.totalorder %s147_s14, %s449_s26 }
  0x40   : > { %p446_p11 = pnand %p444_p1, %p400_p3  ;;  %p452_p7 = scmp.lt.s32.totalorder %s450_s27, %s443_s23 }
  0x42   : > { %p447_p12 = pneg %p446_p11  ;;  %p453_p2 = por %p452_p7, %p451_p6 }
  0x44   : > { %p454_p4 = pnand %p453_p2, %p447_p12 }
  0x46   : > { %457 = shalt.err (!%p454_p4)
}
  0x47   : > { %358 = dma.hbm_to_vmem [thread:$0]  (!%p623_p13), %s670_s7, 128, %s147_s14, %s136_s28  }
  0x48   : > { %p772_p10 = scmp.ne.s32.totalorder %s771_s29, 0 }
  0x49   : > { %s697_s5 = sand.u32 (!%p772_p10), 1, %s520_s10   ;;  %p773_p3 = scmp.ne.s32.totalorder (!%p772_p10), %s765_s20, 0 }
  0x4a   : > { %155 = sbr.rel (%p772_p10) target bundleno = 125 (0x7d), region = 28  ;;  %s338_s6 = sshll.u32 (!%p772_p10), %s697_s5, 3 }
  0x4b   : > { %s158_s8 = scalar_lea.sflag (!%p772_p10), [#allocation3], %s697_s5  ;;  %s161_s30 = scalar_lea.vmem (!%p772_p10), [#allocation2], %s338_s6 }
  0x51   : > { %503 = dma.done.wait (%p773_p3), %s158_s8, 128  }
  0x52   : > { %505 = vsyncadd (%p773_p3), %s158_s8, 4294967168  ;;  %s167_s3 = scalar_lea.sflag [#allocation6], %s697_s5  ;;  %s170_s7 = scalar_lea.vmem [#allocation5], %s338_s6 }
  0x53   : > { %507 = dma.done.wait (%p773_p3), %s167_s3, 128  }
  0x54   : > { %509 = vsyncadd (%p773_p3), %s167_s3, 4294967168  ;;  %v196_v0 = vld [vmem:[%s170_s7] sm:$0xff]  ;;  %v197_v1 = vld [vmem:[%s161_s30] sm:$0xff]  ;;  %v532_v3 = vmov 0.0   ;;  %s340_s20 = sshll.u32 %s697_s5, 1  ;;  %s343_s28 = sshll.u32 %s570_s13, 5 }
  0x55   : > { %vm198_vm0 = vcmp.gt.f32.partialorder %v196_v0, 0.0  ;;  %v199_v2 = vsub.f32 %v196_v0, %v197_v1  ;;  %s195_s29 = scalar_lea.vmem [#allocation7], %s340_s20  ;;  %vm220_vm1 = vcmask 1040384   ;;  %s717_s24 = scalar_lea.hbm %s761_s2, %s343_s28 }
  0x56   : > { %v341_v4 = vsel %vm198_vm0, 1.0, %v532_v3  ;;  %s237_s14 = sshll.u32 %s195_s29, 4  ;;  %s224_s17 = scalar_lea.sflag [#allocation4], %s697_s5  ;;  %s712_s14 = int_to_ptr.vmem [resolvable:$true] %s237_s14 }
  0x57   : > { %v200_v5 = vand.u32 2147483647, %v199_v2  ;;  %v214_v6 = vrot.slane %v341_v4, 4  ;;  %s458_s19 = scalar_lea.vmem %s712_s14, 32  ;;  %p774_p13 = scmp.ne.s32.totalorder %s766_s21, 0 }
  0x58   : > { %p459_p6 = scmp.ne.s32.totalorder %s712_s14, %s458_s19  ;;  %s533_s13 = smov [#allocation7]  }
  0x59   : > { %v201_v7 = vmin.f32 %v200_v5, 19.0  ;;  %v215_v8 = vadd.f32 %v341_v4, %v214_v6  ;;  %s462_s23 = sshll.u32 %s533_s13, 4  ;;  %s463_s23 = int_to_ptr.vmem [resolvable:$false] %s462_s23 }
  0x5a   : > { %p460_p7 = pnand %p459_p6, %p774_p13  ;;  %s464_s25 = scalar_lea.vmem %s463_s23, 64 }
  0x5b   : > { %v202_v9 = vmul.f32 0.5, %v201_v7  ;;  %v216_v11 = vrot.slane %v215_v8, 2  ;;  %p465_p8 = scmp.lt.s32.totalorder %s712_s14, %s463_s23  ;;  %p466_p9 = scmp.lt.s32.totalorder %s464_s25, %s458_s19 }
  0x5c   : > { %p461_p5 = pneg %p460_p7 }
  0x5d   : > { %v203_v10 = vsub.f32 %v200_v5, %v202_v9  ;;  %v217_v15 = vadd.f32 %v216_v11, %v215_v8  ;;  %p467_p0 = por %p466_p9, %p465_p8 }
  0x5f   : > { %v204_v12 = vmul.f32 %v203_v10, %v201_v7  ;;  %v218_v18 = vrot.slane %v217_v15, 1  ;;  %p468_p1 = pnand %p467_p0, %p461_p5 }
  0x61   : > { %v205_v13 = vsel %vm198_vm0, %v204_v12, 0.0  ;;  %v219_v21 = vadd.f32 %v218_v18, %v217_v15 }
  0x62   : > { %v206_v14 = vrot.slane %v205_v13, 4 }
  0x64   : > { %v207_v16 = vadd.f32 %v206_v14, %v205_v13 }
  0x66   : > { %v208_v17 = vrot.slane %v207_v16, 2 }
  0x68   : > { %v209_v19 = vadd.f32 %v208_v17, %v207_v16 }
  0x6a   : > { %v210_v20 = vrot.slane %v209_v19, 1 }
  0x6c   : > { %v211_v22 = vadd.f32 %v210_v20, %v209_v19 }
  0x6e   : > { %v221_v23 = vsel %vm220_vm1, %v211_v22, %v219_v21 }
  0x6f   : > { %222 = vst [vmem:[%s195_s29] sm:$0x3] %v221_v23 }
  0x70   : > { %471 = shalt.err (!%p468_p1)
}
  0x71   : > { %s472_s26 = scalar_lea.hbm %s717_s24, 32  ;;  %s476_s6 = scalar_lea.hbm %s761_s2, 64 }
  0x72   : > { %p473_p11 = scmp.ne.s32.totalorder %s717_s24, %s472_s26  ;;  %p477_p4 = scmp.lt.u32.totalorder %s717_s24, %s761_s2 }
  0x73   : > { %p478_p10 = scmp.lt.u32.totalorder %s476_s6, %s472_s26  ;;  %p480_p6 = scmp.lt.u32.totalorder %s472_s26, %s717_s24 }
  0x74   : > { %p474_p12 = pnand %p473_p11, %p774_p13 }
  0x75   : > { %p479_p3 = por %p478_p10, %p477_p4 }
  0x76   : > { %p475_p2 = pneg %p474_p12 }
  0x77   : > { %p481_p7 = por %p480_p6, %p479_p3 }
  0x79   : > { %p482_p5 = pnand %p481_p7, %p475_p2 }
  0x7b   : > { %485 = shalt.err (!%p482_p5)
}
  0x7c   : > { %350 = dma.vmem_to_hbm [thread:$0]  (%p774_p13), %s712_s14, 32, %s717_s24, %s224_s17  }
  0x7d PF: > { %s249_s3 = sand.u32 1, %s516_s9   ;;  %p775_p8 = scmp.ne.s32.totalorder %s767_s22, 0 }
  0x7e   : > { %p776_p9 = scmp.ge.s32.totalorder %s528_s12, 2  ;;  %s250_s7 = scalar_lea.sflag [#allocation4], %s249_s3 }
  0x80   : > { %p360_p0 = pnand %p776_p9, %p775_p8 }
  0x82   : > { %511 = dma.done.wait (!%p360_p0), %s250_s7, 32  }
  0x83   : > { %513 = vsyncadd (!%p360_p0), %s250_s7, 4294967264  ;;  %p18_p1 = scmp.ge.s32.totalorder %s574_s15, 4   ;;  %s777_s9 = smov %s520_s10 }
  0x84   : > { %s778_s10 = smov %s524_s11  ;;  %s779_s11 = smov %s586_s18 }
  0x85   : > { %s780_s12 = smov %s574_s15  ;;  %20 = sbr.rel (!%p18_p1) target bundleno = 7 (0x7), region = 86 }
  0x8c   :  { %255 = vsyncpa [#allocation3], 1 }
  0x8d   :  { %257 = vsyncpa [#allocation3 + $0x1], 1 }
  0x8e   :  { %258 = vsyncpa [#allocation6], 1 }
  0x8f   :  { %260 = vsyncpa [#allocation6 + $0x1], 1 }
  0x90   :  { %261 = vsyncpa [#allocation4], 1 }
  0x91   :  { %263 = vsyncpa [#allocation4 + $0x1], 1 }

</bundles_post_ra>
